<compile_context>
chip_gen: v5e
topology: v5e:2x2
jax: 0.10.0
libtpu: 0.0.40
codegen_flags: <defaults>
</compile_context>

<pallas_src>
import math

import jax
import jax.numpy as jnp
import numpy as np
from jax.experimental import pallas as pl
from jax.experimental.pallas import tpu as pltpu


def _gather_rows_kernel(idx_ref, mem_l_hbm, mem_ab_hbm,
                        out_l_ref, out_ab_ref, sems):
    # idx_ref    : SMEM (n_pad,) int32     (scalar prefetch, padded + clamped)
    # mem_l_hbm  : HBM  (O, D) f32         (memory_space=pl.ANY, manual DMA)
    # mem_ab_hbm : HBM  (O, D) f32
    # out_l_ref  : VMEM (ROWS, D) f32      (this grid step's output tile)
    # out_ab_ref : VMEM (ROWS, D) f32
    # sems       : DMA semaphores, shape (2, ROWS)
    rows = out_l_ref.shape[0]
    base = pl.program_id(0) * rows

    # Issue all row-gather DMAs for this step (2*ROWS in flight).
    @pl.loop(0, rows)
    def _issue(r):
        row = idx_ref[base + r]
        pltpu.make_async_copy(mem_l_hbm.at[row], out_l_ref.at[r],
                              sems.at[0, r]).start()
        pltpu.make_async_copy(mem_ab_hbm.at[row], out_ab_ref.at[r],
                              sems.at[1, r]).start()

    # Drain them all before the pipeline writes the output tiles back to HBM.
    @pl.loop(0, rows)
    def _drain(r):
        # src ref only provides the transfer size for the wait; row 0 is fine.
        pltpu.make_async_copy(mem_l_hbm.at[0], out_l_ref.at[r],
                              sems.at[0, r]).wait()
        pltpu.make_async_copy(mem_ab_hbm.at[0], out_ab_ref.at[r],
                              sems.at[1, r]).wait()


def nce_average_forward(memory_l, memory_ab, idx, batch_size, K,
                        *, rows_per_step=128):
    """Pallas implementation of NCEAverage.forward.

    Returns (weight_t, weight_s), each of shape (batch_size, K, inputSize).
    """
    O, D = memory_l.shape
    N = batch_size * K

    # Clamp indices: OOB HBM/VMEM reads on TPU are silent garbage.
    idx_flat = jnp.clip(idx.reshape(-1).astype(jnp.int32), 0, O - 1)

    # Rows gathered per grid step: all of N if small, else a multiple of 8
    # sublanes (keeps the output BlockSpec (8,128)-legal).
    if N <= rows_per_step:
        rows = N
    else:
        rows = max(8, (rows_per_step // 8) * 8)
    n_pad = ((N + rows - 1) // rows) * rows
    if n_pad != N:
        idx_flat = jnp.concatenate(
            [idx_flat, jnp.zeros((n_pad - N,), jnp.int32)])
    num_steps = n_pad // rows

    grid_spec = pltpu.PrefetchScalarGridSpec(
        num_scalar_prefetch=1,
        grid=(num_steps,),
        in_specs=[
            pl.BlockSpec(memory_space=pl.ANY),   # memory_l stays in HBM
            pl.BlockSpec(memory_space=pl.ANY),   # memory_ab stays in HBM
        ],
        out_specs=[
            pl.BlockSpec((rows, D), lambda i, idx_r: (i, 0)),
            pl.BlockSpec((rows, D), lambda i, idx_r: (i, 0)),
        ],
        scratch_shapes=[pltpu.SemaphoreType.DMA((2, rows))],
    )

    out_l, out_ab = pl.pallas_call(
        _gather_rows_kernel,
        out_shape=(
            jax.ShapeDtypeStruct((n_pad, D), memory_l.dtype),
            jax.ShapeDtypeStruct((n_pad, D), memory_ab.dtype),
        ),
        grid_spec=grid_spec,
        compiler_params=pltpu.CompilerParams(
            dimension_semantics=("parallel",)),
    )(idx_flat, memory_l, memory_ab)

    weight_t = out_l[:N].reshape(batch_size, K, D)
    weight_s = out_ab[:N].reshape(batch_size, K, D)
    return weight_t, weight_s


def init_nce_average(key, input_size, output_size):
    """Deterministic replica of the buffer init:
    torch.rand(O, I) * 2*stdv - stdv  with stdv = 1/sqrt(inputSize/3)."""
    stdv = 1.0 / math.sqrt(input_size / 3)
    k_l, k_ab = jax.random.split(key)
    memory_l = jax.random.uniform(
        k_l, (output_size, input_size), jnp.float32, -stdv, stdv)
    memory_ab = jax.random.uniform(
        k_ab, (output_size, input_size), jnp.float32, -stdv, stdv)
    return memory_l, memory_ab


if __name__ == "__main__":
    inputSize = 32    # feature dim D
    outputSize = 64   # number of memory slots O
    K = 8             # negatives+1 per sample
    batchSize = 2

    key = jax.random.PRNGKey(0)
    k_mem, k_idx, k_y = jax.random.split(key, 3)

    memory_l, memory_ab = init_nce_average(k_mem, inputSize, outputSize)
    idx = jax.random.randint(k_idx, (batchSize, K), 0, outputSize, jnp.int32)
    y = jax.random.randint(k_y, (batchSize,), 0, outputSize, jnp.int32)  # unused in forward

    # Reference (same semantics as torch.index_select + view).
    ref_t = jnp.take(memory_l, idx.reshape(-1), axis=0).reshape(batchSize, K, -1)
    ref_s = jnp.take(memory_ab, idx.reshape(-1), axis=0).reshape(batchSize, K, -1)

    # 1) Single-step path (rows == B*K).
    weight_t, weight_s = nce_average_forward(memory_l, memory_ab, idx,
                                             batchSize, K)
    jax.block_until_ready((weight_t, weight_s))
    assert weight_t.shape == (batchSize, K, inputSize)
    assert weight_s.shape == (batchSize, K, inputSize)
    np.testing.assert_array_equal(np.asarray(weight_t), np.asarray(ref_t))
    np.testing.assert_array_equal(np.asarray(weight_s), np.asarray(ref_s))

    # 2) Multi-step path (2 grid steps of 8 rows) to exercise the pipelined
    #    DMA-gather with padding.
    weight_t2, weight_s2 = nce_average_forward(memory_l, memory_ab, idx,
                                               batchSize, K, rows_per_step=8)
    jax.block_until_ready((weight_t2, weight_s2))
    np.testing.assert_array_equal(np.asarray(weight_t2), np.asarray(ref_t))
    np.testing.assert_array_equal(np.asarray(weight_s2), np.asarray(ref_s))

    print("KERNEL_OK")
</pallas_src>

<mosaic_0001>
module attributes {stable_mosaic.version = 11 : i64} {
  func.func @_gather_rows_kernel(%arg0: i32, %arg1: memref<16xi32, #tpu.memory_space<smem>>, %arg2: memref<64x32xf32, #tpu.memory_space<any>>, %arg3: memref<64x32xf32, #tpu.memory_space<any>>, %arg4: memref<16x32xf32, #tpu.memory_space<vmem>>, %arg5: memref<16x32xf32, #tpu.memory_space<vmem>>, %arg6: memref<2x16x!tpu.dma_semaphore, #tpu.memory_space<semaphore_mem>>) attributes {dimension_semantics = [#tpu.dimension_semantics<parallel>], iteration_bounds = array<i64: 1>, scalar_prefetch = 1 : i64, scratch_operands = 1 : i64, tpu.core_type = #tpu.core_type<tc>, window_params = [{}, {}, {transform_indices = @transform_2, window_bounds = array<i64: 16, 32>}, {transform_indices = @transform_3, window_bounds = array<i64: 16, 32>}]} {
    %c16_i32 = arith.constant 16 : i32
    %0 = arith.muli %arg0, %c16_i32 : i32
    %c0_i32 = arith.constant 0 : i32
    %c16_i32_0 = arith.constant 16 : i32
    %1 = arith.addi %c0_i32, %c16_i32_0 : i32
    %c1_i32 = arith.constant 1 : i32
    scf.for %arg7 = %c0_i32 to %1 step %c1_i32  : i32 {
      %c1_i32_6 = arith.constant 1 : i32
      %3 = arith.muli %arg7, %c1_i32_6 : i32
      %c0_i32_7 = arith.constant 0 : i32
      %4 = arith.addi %c0_i32_7, %3 : i32
      %5 = arith.addi %0, %4 : i32
      %6 = arith.index_cast %5 : i32 to index
      %7 = memref.load %arg1[%6] : memref<16xi32, #tpu.memory_space<smem>>
      %c0_i32_8 = arith.constant 0 : i32
      %c0_i32_9 = arith.constant 0 : i32
      %8 = tpu.memref_slice %arg2[%7, %c0_i32_9] : memref<64x32xf32, #tpu.memory_space<any>> -> memref<1x32xf32, #tpu.memory_space<any>>
      %9 = tpu.memref_squeeze %8 : memref<1x32xf32, #tpu.memory_space<any>> -> memref<32xf32, #tpu.memory_space<any>>
      %c0_i32_10 = arith.constant 0 : i32
      %10 = tpu.memref_slice %arg4[%4, %c0_i32_10] : memref<16x32xf32, #tpu.memory_space<vmem>> -> memref<1x32xf32, #tpu.memory_space<vmem>>
      %11 = tpu.memref_squeeze %10 : memref<1x32xf32, #tpu.memory_space<vmem>> -> memref<32xf32, #tpu.memory_space<vmem>>
      %12 = tpu.memref_slice %arg6[%c0_i32_8, %4] : memref<2x16x!tpu.dma_semaphore, #tpu.memory_space<semaphore_mem>> -> memref<1x1x!tpu.dma_semaphore, #tpu.memory_space<semaphore_mem>>
      %13 = tpu.memref_squeeze %12 : memref<1x1x!tpu.dma_semaphore, #tpu.memory_space<semaphore_mem>> -> memref<!tpu.dma_semaphore, #tpu.memory_space<semaphore_mem>>
      tpu.enqueue_dma source(%9 : memref<32xf32, #tpu.memory_space<any>>) target(%11 : memref<32xf32, #tpu.memory_space<vmem>>) target_semaphore(%13 : memref<!tpu.dma_semaphore, #tpu.memory_space<semaphore_mem>>)
      %c1_i32_11 = arith.constant 1 : i32
      %c0_i32_12 = arith.constant 0 : i32
      %14 = tpu.memref_slice %arg3[%7, %c0_i32_12] : memref<64x32xf32, #tpu.memory_space<any>> -> memref<1x32xf32, #tpu.memory_space<any>>
      %15 = tpu.memref_squeeze %14 : memref<1x32xf32, #tpu.memory_space<any>> -> memref<32xf32, #tpu.memory_space<any>>
      %c0_i32_13 = arith.constant 0 : i32
      %16 = tpu.memref_slice %arg5[%4, %c0_i32_13] : memref<16x32xf32, #tpu.memory_space<vmem>> -> memref<1x32xf32, #tpu.memory_space<vmem>>
      %17 = tpu.memref_squeeze %16 : memref<1x32xf32, #tpu.memory_space<vmem>> -> memref<32xf32, #tpu.memory_space<vmem>>
      %18 = tpu.memref_slice %arg6[%c1_i32_11, %4] : memref<2x16x!tpu.dma_semaphore, #tpu.memory_space<semaphore_mem>> -> memref<1x1x!tpu.dma_semaphore, #tpu.memory_space<semaphore_mem>>
      %19 = tpu.memref_squeeze %18 : memref<1x1x!tpu.dma_semaphore, #tpu.memory_space<semaphore_mem>> -> memref<!tpu.dma_semaphore, #tpu.memory_space<semaphore_mem>>
      tpu.enqueue_dma source(%15 : memref<32xf32, #tpu.memory_space<any>>) target(%17 : memref<32xf32, #tpu.memory_space<vmem>>) target_semaphore(%19 : memref<!tpu.dma_semaphore, #tpu.memory_space<semaphore_mem>>)
    }
    %c16_i32_1 = arith.constant 16 : i32
    %c0_i32_2 = arith.constant 0 : i32
    %c16_i32_3 = arith.constant 16 : i32
    %2 = arith.addi %c0_i32_2, %c16_i32_3 : i32
    %c1_i32_4 = arith.constant 1 : i32
    scf.for %arg7 = %c0_i32_2 to %2 step %c1_i32_4  : i32 {
      %c1_i32_6 = arith.constant 1 : i32
      %3 = arith.muli %arg7, %c1_i32_6 : i32
      %c0_i32_7 = arith.constant 0 : i32
      %4 = arith.addi %c0_i32_7, %3 : i32
      %c0_i32_8 = arith.constant 0 : i32
      %c0_i32_9 = arith.constant 0 : i32
      %c0_i32_10 = arith.constant 0 : i32
      %5 = tpu.memref_slice %arg2[%c0_i32_8, %c0_i32_10] : memref<64x32xf32, #tpu.memory_space<any>> -> memref<1x32xf32, #tpu.memory_space<any>>
      %6 = tpu.memref_squeeze %5 : memref<1x32xf32, #tpu.memory_space<any>> -> memref<32xf32, #tpu.memory_space<any>>
      %c0_i32_11 = arith.constant 0 : i32
      %7 = tpu.memref_slice %arg4[%4, %c0_i32_11] : memref<16x32xf32, #tpu.memory_space<vmem>> -> memref<1x32xf32, #tpu.memory_space<vmem>>
      %8 = tpu.memref_squeeze %7 : memref<1x32xf32, #tpu.memory_space<vmem>> -> memref<32xf32, #tpu.memory_space<vmem>>
      %9 = tpu.memref_slice %arg6[%c0_i32_9, %4] : memref<2x16x!tpu.dma_semaphore, #tpu.memory_space<semaphore_mem>> -> memref<1x1x!tpu.dma_semaphore, #tpu.memory_space<semaphore_mem>>
      %10 = tpu.memref_squeeze %9 : memref<1x1x!tpu.dma_semaphore, #tpu.memory_space<semaphore_mem>> -> memref<!tpu.dma_semaphore, #tpu.memory_space<semaphore_mem>>
      tpu.wait_dma2 semaphore(%10 : memref<!tpu.dma_semaphore, #tpu.memory_space<semaphore_mem>>) src(%6 : memref<32xf32, #tpu.memory_space<any>>) dst(%8 : memref<32xf32, #tpu.memory_space<vmem>>)
      %c0_i32_12 = arith.constant 0 : i32
      %c1_i32_13 = arith.constant 1 : i32
      %c0_i32_14 = arith.constant 0 : i32
      %11 = tpu.memref_slice %arg3[%c0_i32_12, %c0_i32_14] : memref<64x32xf32, #tpu.memory_space<any>> -> memref<1x32xf32, #tpu.memory_space<any>>
      %12 = tpu.memref_squeeze %11 : memref<1x32xf32, #tpu.memory_space<any>> -> memref<32xf32, #tpu.memory_space<any>>
      %c0_i32_15 = arith.constant 0 : i32
      %13 = tpu.memref_slice %arg5[%4, %c0_i32_15] : memref<16x32xf32, #tpu.memory_space<vmem>> -> memref<1x32xf32, #tpu.memory_space<vmem>>
      %14 = tpu.memref_squeeze %13 : memref<1x32xf32, #tpu.memory_space<vmem>> -> memref<32xf32, #tpu.memory_space<vmem>>
      %15 = tpu.memref_slice %arg6[%c1_i32_13, %4] : memref<2x16x!tpu.dma_semaphore, #tpu.memory_space<semaphore_mem>> -> memref<1x1x!tpu.dma_semaphore, #tpu.memory_space<semaphore_mem>>
      %16 = tpu.memref_squeeze %15 : memref<1x1x!tpu.dma_semaphore, #tpu.memory_space<semaphore_mem>> -> memref<!tpu.dma_semaphore, #tpu.memory_space<semaphore_mem>>
      tpu.wait_dma2 semaphore(%16 : memref<!tpu.dma_semaphore, #tpu.memory_space<semaphore_mem>>) src(%12 : memref<32xf32, #tpu.memory_space<any>>) dst(%14 : memref<32xf32, #tpu.memory_space<vmem>>)
    }
    %c16_i32_5 = arith.constant 16 : i32
    return
  }
  func.func @transform_2(%arg0: i32, %arg1: memref<16xi32, #tpu.memory_space<smem>>) -> (i32, i32) {
    %c0_i32 = arith.constant 0 : i32
    %c0_i32_0 = arith.constant 0 : i32
    return %arg0, %c0_i32 : i32, i32
  }
  func.func @transform_3(%arg0: i32, %arg1: memref<16xi32, #tpu.memory_space<smem>>) -> (i32, i32) {
    %c0_i32 = arith.constant 0 : i32
    %c0_i32_0 = arith.constant 0 : i32
    return %arg0, %c0_i32 : i32, i32
  }
}

</mosaic_0001>

<bundles_post_ra>
// kernel: tpu_custom_call.1
= control target key start
LH: loop header
LB: loop body
LE: loop exit
PB: predicated region body
PF: predicated region fallthrough
CT: control target
= control target key end

     0   :  { %s543_s18 = smov [#allocation4]   ;;  %s588_s0 = inlined_call_operand.vmem [shape: s32[16], index: 0, kind: input, shape index: {}]   ;;  %s589_s1 = inlined_call_operand.vmem [shape: f32[64,32], index: 1, kind: input, shape index: {}]   ;;  %s590_s2 = inlined_call_operand.vmem [shape: f32[64,32], index: 2, kind: input, shape index: {}]   ;;  %s591_s3 = inlined_call_operand.hbm [shape: f32[16,32], index: 3, kind: output, shape index: {0}]   ;;  %s592_s4 = inlined_call_operand.hbm [shape: f32[16,32], index: 4, kind: output, shape index: {1}]  }
   0x1   :  { %s11_s17 = sshll.u32 %s588_s0, 4  ;;  %s12_s17 = int_to_ptr.vmem [resolvable:$true] %s11_s17 }
   0x2   :  { %14 = dma.vmem_to_smem %s12_s17, 16, %s543_s18, [#allocation3] }
   0x3   :  { %525 = dma.done.wait [#allocation3], 16 }
   0x4   :  { %526 = vsyncadd [#allocation3], 4294967280 }
   0x5   :  { %17 = sfence }
   0x6   :  { %18 = vsyncpa [#allocation6], 0 }
   0x7   :  { %19 = vsyncpa [#allocation8], 0  ;;  %s535_s19 = smov 0  }
   0x8 LB: > { %s28_s20 = sld [smem:[#allocation4 + %s537_s19]]  ;;  %s30_s24 = scalar_lea.vmem [#allocation5], %s537_s19  ;;  %s537_s19 = sphi %s535_s19, %s26_s19  }
   0x9   : > { %s31_s0 = scalar_lea.sflag [#allocation2], %s537_s19 }
   0xe   : > { %s29_s23 = scalar_lea.vmem %s589_s1, %s28_s20 }
   0xf   : > { %v46_v0 = vld [vmem:[%s29_s23] sm:$0x1] }
  0x10   : > { %47 = vst [vmem:[%s30_s24] sm:$0x1] %v46_v0 }
  0x11   : > { %65 = vsyncadd %s31_s0, 16  ;;  %s66_s27 = scalar_lea.vmem %s590_s2, %s28_s20  ;;  %s382_s28 = scalar_lea.sflag %s31_s0, 16 [#allocation2] }
  0x12   : > { %v84_v1 = vld [vmem:[%s66_s27] sm:$0x1]  ;;  %s67_s29 = scalar_lea.vmem [#allocation7], %s537_s19 }
  0x13   : > { %85 = vst [vmem:[%s67_s29] sm:$0x1] %v84_v1 }
  0x14   : > { %103 = vsyncadd %s382_s28, 16  ;;  %s26_s19 = sadd.s32 1, %s537_s19  }
  0x15   : > { %p23_p0 = scmp.ge.s32.totalorder %s26_s19, 16  }
  0x16   :  { %s539_s30 = smov (%p23_p0), 0  }
  0x17   :  { %25 = sbr.rel (!%p23_p0) target bundleno = 8 (0x8), region = 149 }
  0x1c LB: > { %s110_s5 = scalar_lea.sflag [#allocation2], %s541_s30  ;;  %s541_s30 = sphi %s539_s30, %s109_s30  }
  0x1d   : > { %527 = dma.done.wait %s110_s5, 16 }
  0x1e   : > { %528 = vsyncadd %s110_s5, 4294967280  ;;  %s385_s6 = scalar_lea.sflag %s110_s5, 16 [#allocation2] }
  0x1f   : > { %529 = dma.done.wait %s385_s6, 16 }
  0x20   : > { %530 = vsyncadd %s385_s6, 4294967280  ;;  %s109_s30 = sadd.s32 1, %s541_s30  }
  0x21   : > { %p106_p1 = scmp.ge.s32.totalorder %s109_s30, 16  }
  0x22   :  { %s123_s9 = sshll.u32 (%p106_p1), %s591_s3, 4  ;;  %s544_s10 = smov (%p106_p1), [#allocation5]   ;;  %s124_s9 = int_to_ptr.hbm [resolvable:$true] %s123_s9 }
  0x23   :  { %108 = sbr.rel (!%p106_p1) target bundleno = 28 (0x1c), region = 160  ;;  %s121_s11 = sshll.u32 (%p106_p1), %s544_s10, 4  ;;  %s122_s11 = int_to_ptr.vmem [resolvable:$true] %s121_s11 }
  0x24   :  { %s545_s1 = smov (%p106_p1), 128   ;;  %s546_s2 = smov (%p106_p1), 8  }
  0x25   :  { %129 = dma.vmem_to_hbm [thread:$0]  (%p106_p1), %s122_s11, 256, %s124_s9, [#allocation6], %s545_s1, %s545_s1, %s546_s2  }
  0x26   :  { %s547_s12 = smov (%p106_p1), [#allocation7]   ;;  %s136_s16 = sshll.u32 (%p106_p1), %s592_s4, 4  ;;  %s137_s16 = int_to_ptr.hbm [resolvable:$true] %s136_s16 }
  0x27   :  { %s134_s13 = sshll.u32 (%p106_p1), %s547_s12, 4  ;;  %s135_s13 = int_to_ptr.vmem [resolvable:$true] %s134_s13 }
  0x28   :  { %142 = dma.vmem_to_hbm [thread:$0]  %s135_s13, 256, %s137_s16, [#allocation8], %s545_s1, %s545_s1, %s546_s2  }
  0x29   :  { %531 = dma.done.wait [#allocation6], 256  }
  0x2a   :  { %532 = vsyncadd [#allocation6], 4294967040 }
  0x2b   :  { %533 = dma.done.wait [#allocation8], 256  }
  0x2c   :  { %534 = vsyncadd [#allocation8], 4294967040 }
  0x2d   :  { %151 = vsyncpa [#allocation6], 1 }
  0x2e   :  { %152 = vsyncpa [#allocation8], 1 }
  0x2f   :  { %153 = vsyncmov [#allocation2] }
  0x32   :  { %s154_s3 = vpop.sfrf %153 }
  0x33   :  { %p404_p2 = scmp.ne.s32.totalorder %s154_s3, 0 }
  0x35   :  { %158 = shalt.err (%p404_p2)  }
  0x36   :  { %160 = vsyncmov [#allocation2 + $0x1] }
  0x39   :  { %s161_s17 = vpop.sfrf %160 }
  0x3a   :  { %p405_p3 = scmp.ne.s32.totalorder %s161_s17, 0 }
  0x3c   :  { %165 = shalt.err (%p405_p3)  }
  0x3d   :  { %167 = vsyncmov [#allocation2 + $0x2] }
  0x40   :  { %s168_s18 = vpop.sfrf %167 }
  0x41   :  { %p406_p4 = scmp.ne.s32.totalorder %s168_s18, 0 }
  0x43   :  { %172 = shalt.err (%p406_p4)  }
  0x44   :  { %174 = vsyncmov [#allocation2 + $0x3] }
  0x47   :  { %s175_s4 = vpop.sfrf %174 }
  0x48   :  { %p407_p5 = scmp.ne.s32.totalorder %s175_s4, 0 }
  0x4a   :  { %179 = shalt.err (%p407_p5)  }
  0x4b   :  { %181 = vsyncmov [#allocation2 + $0x4] }
  0x4e   :  { %s182_s19 = vpop.sfrf %181 }
  0x4f   :  { %p408_p6 = scmp.ne.s32.totalorder %s182_s19, 0 }
  0x51   :  { %186 = shalt.err (%p408_p6)  }
  0x52   :  { %188 = vsyncmov [#allocation2 + $0x5] }
  0x55   :  { %s189_s20 = vpop.sfrf %188 }
  0x56   :  { %p409_p7 = scmp.ne.s32.totalorder %s189_s20, 0 }
  0x58   :  { %193 = shalt.err (%p409_p7)  }
  0x59   :  { %195 = vsyncmov [#allocation2 + $0x6] }
  0x5c   :  { %s196_s21 = vpop.sfrf %195 }
  0x5d   :  { %p410_p8 = scmp.ne.s32.totalorder %s196_s21, 0 }
  0x5f   :  { %200 = shalt.err (%p410_p8)  }
  0x60   :  { %202 = vsyncmov [#allocation2 + $0x7] }
  0x63   :  { %s203_s22 = vpop.sfrf %202 }
  0x64   :  { %p411_p9 = scmp.ne.s32.totalorder %s203_s22, 0 }
  0x66   :  { %207 = shalt.err (%p411_p9)  }
  0x67   :  { %209 = vsyncmov [#allocation2 + $0x8] }
  0x6a   :  { %s210_s23 = vpop.sfrf %209 }
  0x6b   :  { %p412_p10 = scmp.ne.s32.totalorder %s210_s23, 0 }
  0x6d   :  { %214 = shalt.err (%p412_p10)  }
  0x6e   :  { %216 = vsyncmov [#allocation2 + $0x9] }
  0x71   :  { %s217_s24 = vpop.sfrf %216 }
  0x72   :  { %p413_p11 = scmp.ne.s32.totalorder %s217_s24, 0 }
  0x74   :  { %221 = shalt.err (%p413_p11)  }
  0x75   :  { %223 = vsyncmov [#allocation2 + $0xa] }
  0x78   :  { %s224_s0 = vpop.sfrf %223 }
  0x79   :  { %p414_p12 = scmp.ne.s32.totalorder %s224_s0, 0 }
  0x7b   :  { %228 = shalt.err (%p414_p12)  }
  0x7c   :  { %230 = vsyncmov [#allocation2 + $0xb] }
  0x7f   :  { %s231_s25 = vpop.sfrf %230 }
  0x80   :  { %p415_p13 = scmp.ne.s32.totalorder %s231_s25, 0 }
  0x82   :  { %235 = shalt.err (%p415_p13)  }
  0x83   :  { %237 = vsyncmov [#allocation2 + $0xc] }
  0x86   :  { %s238_s26 = vpop.sfrf %237 }
  0x87   :  { %p416_p0 = scmp.ne.s32.totalorder %s238_s26, 0 }
  0x89   :  { %242 = shalt.err (%p416_p0)  }
  0x8a   :  { %244 = vsyncmov [#allocation2 + $0xd] }
  0x8d   :  { %s245_s27 = vpop.sfrf %244 }
  0x8e   :  { %p417_p1 = scmp.ne.s32.totalorder %s245_s27, 0 }
  0x90   :  { %249 = shalt.err (%p417_p1)  }
  0x91   :  { %251 = vsyncmov [#allocation2 + $0xe] }
  0x94   :  { %s252_s28 = vpop.sfrf %251 }
  0x95   :  { %p418_p2 = scmp.ne.s32.totalorder %s252_s28, 0 }
  0x97   :  { %256 = shalt.err (%p418_p2)  }
  0x98   :  { %258 = vsyncmov [#allocation2 + $0xf] }
  0x9b   :  { %s259_s29 = vpop.sfrf %258 }
  0x9c   :  { %p419_p3 = scmp.ne.s32.totalorder %s259_s29, 0 }
  0x9e   :  { %263 = shalt.err (%p419_p3)  }
  0x9f   :  { %265 = vsyncmov [#allocation2 + $0x10] }
  0xa2   :  { %s266_s30 = vpop.sfrf %265 }
  0xa3   :  { %p420_p4 = scmp.ne.s32.totalorder %s266_s30, 0 }
  0xa5   :  { %270 = shalt.err (%p420_p4)  }
  0xa6   :  { %272 = vsyncmov [#allocation2 + $0x11] }
  0xa9   :  { %s273_s5 = vpop.sfrf %272 }
  0xaa   :  { %p421_p5 = scmp.ne.s32.totalorder %s273_s5, 0 }
  0xac   :  { %277 = shalt.err (%p421_p5)  }
  0xad   :  { %279 = vsyncmov [#allocation2 + $0x12] }
  0xb0   :  { %s280_s6 = vpop.sfrf %279 }
  0xb1   :  { %p422_p6 = scmp.ne.s32.totalorder %s280_s6, 0 }
  0xb3   :  { %284 = shalt.err (%p422_p6)  }
  0xb4   :  { %286 = vsyncmov [#allocation2 + $0x13] }
  0xb7   :  { %s287_s7 = vpop.sfrf %286 }
  0xb8   :  { %p423_p7 = scmp.ne.s32.totalorder %s287_s7, 0 }
  0xba   :  { %291 = shalt.err (%p423_p7)  }
  0xbb   :  { %293 = vsyncmov [#allocation2 + $0x14] }
  0xbe   :  { %s294_s8 = vpop.sfrf %293 }
  0xbf   :  { %p424_p8 = scmp.ne.s32.totalorder %s294_s8, 0 }
  0xc1   :  { %298 = shalt.err (%p424_p8)  }
  0xc2   :  { %300 = vsyncmov [#allocation2 + $0x15] }
  0xc5   :  { %s301_s9 = vpop.sfrf %300 }
  0xc6   :  { %p425_p9 = scmp.ne.s32.totalorder %s301_s9, 0 }
  0xc8   :  { %305 = shalt.err (%p425_p9)  }
  0xc9   :  { %307 = vsyncmov [#allocation2 + $0x16] }
  0xcc   :  { %s308_s10 = vpop.sfrf %307 }
  0xcd   :  { %p426_p10 = scmp.ne.s32.totalorder %s308_s10, 0 }
  0xcf   :  { %312 = shalt.err (%p426_p10)  }
  0xd0   :  { %314 = vsyncmov [#allocation2 + $0x17] }
  0xd3   :  { %s315_s11 = vpop.sfrf %314 }
  0xd4   :  { %p427_p11 = scmp.ne.s32.totalorder %s315_s11, 0 }
  0xd6   :  { %319 = shalt.err (%p427_p11)  }
  0xd7   :  { %321 = vsyncmov [#allocation2 + $0x18] }
  0xda   :  { %s322_s1 = vpop.sfrf %321 }
  0xdb   :  { %p428_p12 = scmp.ne.s32.totalorder %s322_s1, 0 }
  0xdd   :  { %326 = shalt.err (%p428_p12)  }
  0xde   :  { %328 = vsyncmov [#allocation2 + $0x19] }
  0xe1   :  { %s329_s2 = vpop.sfrf %328 }
  0xe2   :  { %p429_p13 = scmp.ne.s32.totalorder %s329_s2, 0 }
  0xe4   :  { %333 = shalt.err (%p429_p13)  }
  0xe5   :  { %335 = vsyncmov [#allocation2 + $0x1a] }
  0xe8   :  { %s336_s12 = vpop.sfrf %335 }
  0xe9   :  { %p430_p0 = scmp.ne.s32.totalorder %s336_s12, 0 }
  0xeb   :  { %340 = shalt.err (%p430_p0)  }
  0xec   :  { %342 = vsyncmov [#allocation2 + $0x1b] }
  0xef   :  { %s343_s13 = vpop.sfrf %342 }
  0xf0   :  { %p431_p1 = scmp.ne.s32.totalorder %s343_s13, 0 }
  0xf2   :  { %347 = shalt.err (%p431_p1)  }
  0xf3   :  { %349 = vsyncmov [#allocation2 + $0x1c] }
  0xf6   :  { %s350_s14 = vpop.sfrf %349 }
  0xf7   :  { %p432_p2 = scmp.ne.s32.totalorder %s350_s14, 0 }
  0xf9   :  { %354 = shalt.err (%p432_p2)  }
  0xfa   :  { %356 = vsyncmov [#allocation2 + $0x1d] }
  0xfd   :  { %s357_s15 = vpop.sfrf %356 }
  0xfe   :  { %p433_p3 = scmp.ne.s32.totalorder %s357_s15, 0 }
 0x100   :  { %361 = shalt.err (%p433_p3)  }
 0x101   :  { %363 = vsyncmov [#allocation2 + $0x1e] }
 0x104   :  { %s364_s16 = vpop.sfrf %363 }
 0x105   :  { %p434_p4 = scmp.ne.s32.totalorder %s364_s16, 0 }
 0x107   :  { %368 = shalt.err (%p434_p4)  }
 0x108   :  { %370 = vsyncmov [#allocation2 + $0x1f] }
 0x10b   :  { %s371_s3 = vpop.sfrf %370 }
 0x10c   :  { %p435_p5 = scmp.ne.s32.totalorder %s371_s3, 0 }
 0x10e   :  { %375 = shalt.err (%p435_p5)  }

</bundles_post_ra>
